<compile_context>
chip_gen: v5e
topology: v5e:2x2
jax: 0.10.0
libtpu: 0.0.40
codegen_flags: <defaults>
</compile_context>

<pallas_src>
import jax
import jax.numpy as jnp
from jax.experimental import pallas as pl
from jax.experimental.pallas import tpu as pltpu

_LANE = 128


def _hsigmoid_kernel(x_ref, o_ref):
    x = x_ref[...]
    dt = x.dtype
    # relu6(x + 3) / 6  == min(max(x + 3, 0), 6) * (1/6); 4 VPU ops per vreg.
    y = jnp.minimum(jnp.maximum(x + jnp.asarray(3.0, dt), jnp.asarray(0.0, dt)),
                    jnp.asarray(6.0, dt)) * jnp.asarray(1.0 / 6.0, dt)
    o_ref[...] = y.astype(o_ref.dtype)


def _hsigmoid_2d(x2d, block_rows):
    rows, lane = x2d.shape
    # Clamp the block to the array: either the full row extent (always a legal
    # block) or `block_rows` (a multiple of 8/16/32 sublanes).
    br = min(block_rows, rows)
    grid = (pl.cdiv(rows, br),)
    return pl.pallas_call(
        _hsigmoid_kernel,
        out_shape=jax.ShapeDtypeStruct((rows, lane), x2d.dtype),
        grid_spec=pltpu.PrefetchScalarGridSpec(
            num_scalar_prefetch=0,
            grid=grid,
            in_specs=[pl.BlockSpec((br, lane), lambda i: (i, 0))],
            out_specs=pl.BlockSpec((br, lane), lambda i: (i, 0)),
        ),
        compiler_params=pltpu.CompilerParams(
            dimension_semantics=("parallel",)),
    )(x2d)


def hsigmoid(x, *, block_rows=1024):
    """Elementwise hard-sigmoid (relu6(x+3)/6) via a Pallas TPU kernel.

    Supports floating-point inputs of any shape. Internally flattens to a
    lane-dense (rows, 128) slab; no padding copy when x.size % 128 == 0.
    """
    if not jnp.issubdtype(x.dtype, jnp.floating):
        raise TypeError(f"hsigmoid expects a floating dtype, got {x.dtype}")

    orig_shape = x.shape
    n = x.size
    flat = x.reshape(-1)

    if n % _LANE == 0:
        # Fast path: zero-copy reshape to a lane-dense slab, no pad/slice.
        out2d = _hsigmoid_2d(flat.reshape(n // _LANE, _LANE), block_rows)
        return out2d.reshape(orig_shape)

    # Ragged path (rare): pad the tail up to a lane multiple, slice afterwards.
    n_pad = pl.cdiv(n, _LANE) * _LANE
    flat_p = jnp.pad(flat, (0, n_pad - n))
    out2d = _hsigmoid_2d(flat_p.reshape(n_pad // _LANE, _LANE), block_rows)
    return out2d.reshape(-1)[:n].reshape(orig_shape)


def hsigmoid_ref(x):
    # Pure-JAX reference for correctness checking.
    return jnp.clip(x + 3.0, 0.0, 6.0) / 6.0


if __name__ == "__main__":
    key = jax.random.PRNGKey(0)
    # Small NCHW input consistent with typical HSigmoid usage.
    x = jax.random.normal(key, (2, 4, 16, 16), dtype=jnp.float32) * 4.0

    out = jax.block_until_ready(hsigmoid(x))
    ref = hsigmoid_ref(x)
    assert out.shape == x.shape and out.dtype == x.dtype
    assert jnp.max(jnp.abs(out - ref)) < 1e-6

    # Also exercise the ragged (non-128-multiple) path at a tiny size.
    x2 = jax.random.normal(jax.random.PRNGKey(1), (2, 3, 7, 5), dtype=jnp.float32)
    out2 = jax.block_until_ready(hsigmoid(x2))
    assert jnp.max(jnp.abs(out2 - hsigmoid_ref(x2))) < 1e-6

    print("KERNEL_OK")
</pallas_src>

<mosaic_0001>
module attributes {stable_mosaic.version = 11 : i64} {
  func.func @_hsigmoid_kernel(%arg0: i32, %arg1: memref<16x128xf32, #tpu.memory_space<vmem>>, %arg2: memref<16x128xf32, #tpu.memory_space<vmem>>) attributes {dimension_semantics = [#tpu.dimension_semantics<parallel>], iteration_bounds = array<i64: 1>, scalar_prefetch = 0 : i64, scratch_operands = 0 : i64, tpu.core_type = #tpu.core_type<tc>, window_params = [{transform_indices = @transform_0, window_bounds = array<i64: 16, 128>}, {transform_indices = @transform_1, window_bounds = array<i64: 16, 128>}]} {
    %c0 = arith.constant 0 : index
    %c0_0 = arith.constant 0 : index
    %0 = vector.load %arg1[%c0, %c0_0] : memref<16x128xf32, #tpu.memory_space<vmem>>, vector<16x128xf32>
    %cst = arith.constant 3.000000e+00 : f32
    %1 = vector.broadcast %cst : f32 to vector<16x128xf32>
    %2 = arith.addf %0, %1 : vector<16x128xf32>
    %cst_1 = arith.constant 0.000000e+00 : f32
    %3 = vector.broadcast %cst_1 : f32 to vector<16x128xf32>
    %4 = arith.maximumf %2, %3 : vector<16x128xf32>
    %cst_2 = arith.constant 6.000000e+00 : f32
    %5 = vector.broadcast %cst_2 : f32 to vector<16x128xf32>
    %6 = arith.minimumf %4, %5 : vector<16x128xf32>
    %cst_3 = arith.constant 0.166666672 : f32
    %7 = vector.broadcast %cst_3 : f32 to vector<16x128xf32>
    %8 = arith.mulf %6, %7 : vector<16x128xf32>
    %c0_4 = arith.constant 0 : index
    %c0_5 = arith.constant 0 : index
    %9 = vector.load %arg2[%c0_4, %c0_5] : memref<16x128xf32, #tpu.memory_space<vmem>>, vector<16x128xf32>
    tpu.vector_store %arg2[%c0_4, %c0_5], %8 {strides = array<i32>} : memref<16x128xf32, #tpu.memory_space<vmem>>, vector<16x128xf32>,
    return
  }
  func.func @transform_0(%arg0: i32) -> (i32, i32) {
    %c0_i32 = arith.constant 0 : i32
    %c0_i32_0 = arith.constant 0 : i32
    return %arg0, %c0_i32 : i32, i32
  }
  func.func @transform_1(%arg0: i32) -> (i32, i32) {
    %c0_i32 = arith.constant 0 : i32
    %c0_i32_0 = arith.constant 0 : i32
    return %arg0, %c0_i32 : i32, i32
  }
}

</mosaic_0001>

<bundles_post_ra>
// kernel: tpu_custom_call.1
= control target key start
LH: loop header
LB: loop body
LE: loop exit
PB: predicated region body
PF: predicated region fallthrough
CT: control target
= control target key end

     0   :  { %6 = vsyncpa [#allocation3], 0  ;;  %s132_s0 = inlined_call_operand.hbm [shape: f32[16,128], index: 0, kind: input, shape index: {}]   ;;  %s133_s1 = inlined_call_operand.hbm [shape: f32[16,128], index: 1, kind: output, shape index: {}]  }
   0x1   :  { %7 = vsyncpa [#allocation4], 0  ;;  %s12_s8 = sshll.u32 %s132_s0, 4  ;;  %s112_s9 = smov [#allocation2]   ;;  %s13_s8 = int_to_ptr.hbm [resolvable:$true] %s12_s8 }
   0x2   :  { %s14_s10 = sshll.u32 %s112_s9, 4  ;;  %s113_s11 = smov 128   ;;  %s15_s10 = int_to_ptr.vmem [resolvable:$true] %s14_s10 }
   0x3   :  { %s114_s12 = smov 8  }
   0x4   :  { %20 = dma.hbm_to_vmem [thread:$0]  %s13_s8, 256, %s15_s10, [#allocation3], %s113_s11, %s113_s11, %s114_s12  }
   0x5   :  { %108 = dma.done.wait [#allocation3], 256  }
   0x6   :  { %109 = vsyncadd [#allocation3], 4294967040  ;;  %v25_v0 = vld [vmem:[#allocation2] sm:$0xff]  ;;  %v26_v1 = vld [vmem:[#allocation2 + $0x8] sm:$0xff]  ;;  %s115_s13 = smov [#allocation5]   ;;  %s43_s16 = sshll.u32 %s133_s1, 4  ;;  %s44_s16 = int_to_ptr.hbm [resolvable:$true] %s43_s16 }
   0x7   :  { %v27_v2 = vadd.f32 3.0, %v25_v0  ;;  %v28_v3 = vadd.f32 3.0, %v26_v1  ;;  %s41_s14 = sshll.u32 %s115_s13, 4  ;;  %s42_s14 = int_to_ptr.vmem [resolvable:$true] %s41_s14 }
   0x9   :  { %v29_v4 = vmax.f32 %v27_v2, 0.0  ;;  %v30_v5 = vmax.f32 %v28_v3, 0.0 }
   0xb   :  { %v31_v6 = vmin.f32 %v29_v4, 6.0  ;;  %v32_v7 = vmin.f32 %v30_v5, 6.0 }
   0xd   :  { %v33_v8 = vmul.f32 0.16666667, %v31_v6  ;;  %v34_v9 = vmul.f32 0.16666667, %v32_v7 }
   0xf   :  { %35 = vst [vmem:[#allocation5] sm:$0xff] %v33_v8 }
  0x10   :  { %36 = vst [vmem:[#allocation5 + $0x8] sm:$0xff] %v34_v9 }
  0x11   :  { %49 = dma.vmem_to_hbm [thread:$0]  %s42_s14, 256, %s44_s16, [#allocation4], %s113_s11, %s113_s11, %s114_s12  }
  0x12   :  { %110 = dma.done.wait [#allocation4], 256  }
  0x13   :  { %111 = vsyncadd [#allocation4], 4294967040 }
  0x14   :  { %54 = vsyncpa [#allocation3], 1 }
  0x15   :  { %55 = vsyncpa [#allocation4], 1 }

</bundles_post_ra>
